<compile_context>
chip_gen: v7x
topology: tpu7x:2x2x1
jax: 0.10.0
libtpu: 0.0.40
codegen_flags: <defaults>
</compile_context>

<pallas_src>
import functools

import jax
import jax.numpy as jnp
from jax.experimental import pallas as pl
from jax.experimental.pallas import tpu as pltpu

_GN_EPS = 1e-5  # nn.GroupNorm default


def _sa_kernel(params_ref, x0_ref, x1_ref, out_ref, *, groups):
    """x0_ref: (TB, TD, HW) block of channels a=0 (original channel d)
       x1_ref: (TB, TD, HW) block of channels a=1 (original channel groups+d)
       out_ref:(TB, TD, 2*HW) block of the channel-shuffled output:
               cols [0:HW]   -> final channel 2*d   ; cols [HW:2HW] -> 2*d+1
    """
    w1 = params_ref[0]    # conv1 weight (channel-attn branch)
    b1 = params_ref[1]    # conv1 bias
    w2 = params_ref[2]    # conv2 weight (spatial-attn branch)
    b2 = params_ref[3]    # conv2 bias
    gamma = params_ref[4]  # GroupNorm weight
    beta = params_ref[5]   # GroupNorm bias

    tb, td, hw = x0_ref.shape
    d0 = pl.program_id(1) * td
    d = d0 + jax.lax.broadcasted_iota(jnp.int32, (1, td, 1), 1)   # (1, TD, 1)
    inv_hw = jnp.float32(1.0 / hw)

    def branch(x, a_channel_offset):
        # Per-row (lane-axis) stats only; branch chosen by original-channel parity.
        xf = x.astype(jnp.float32)
        mean = jnp.sum(xf, axis=-1, keepdims=True) * inv_hw            # (TB,TD,1)
        ex2 = jnp.sum(xf * xf, axis=-1, keepdims=True) * inv_hw
        var = jnp.maximum(ex2 - mean * mean, jnp.float32(0.0))
        inv_std = jax.lax.rsqrt(var + _GN_EPS)
        # spatial branch folded to per-row affine: sigmoid(x*A + B)
        a_sp = w2 * gamma * inv_std
        b_sp = w2 * (beta - gamma * mean * inv_std) + b2
        # channel branch: sigmoid(0*x + (w1*mean + b1))
        b_ch = w1 * mean + b1
        is_spatial = ((a_channel_offset + d) % 2) == 1                 # (1,TD,1)
        a_row = jnp.where(is_spatial, a_sp, jnp.float32(0.0))
        b_row = jnp.where(is_spatial, b_sp, b_ch)
        attn = jax.nn.sigmoid(xf * a_row + b_row)
        return (xf * attn).astype(out_ref.dtype)

    out_ref[:, :, :hw] = branch(x0_ref[...], 0)        # a = 0  -> final ch 2*d
    out_ref[:, :, hw:] = branch(x1_ref[...], groups)   # a = 1  -> final ch 2*d+1


@functools.partial(jax.jit, static_argnums=2)
def sa_layer_forward(x, params, groups):
    """x: (b, c, h, w) float32, NCHW (matches the PyTorch module)."""
    b, c, h, w = x.shape
    assert c == 2 * groups, "Conv2d(1,1,1)/GroupNorm(1,1) require channel == 2*groups"
    hw = h * w

    # Free contiguous reshape; channel decomposes as a*groups + d (the same
    # decomposition channel_shuffle(·, 2) uses), so the shuffle is fused into
    # the output layout below.
    xv = x.reshape(b, 2, groups, hw)

    # --- tile sizing: ~2 MiB per input slab; all live buffers stay well under
    #     the 48 MiB VMEM budget (safe on v7x's 64 MiB, roomy on v5e/v6e).
    target_rows = max(8, (2 * 1024 * 1024) // (4 * hw))
    if groups % 8 == 0 and groups > target_rows:
        td = max(8, (target_rows // 8) * 8)
        while groups % td:          # keep d-tiles non-ragged
            td -= 8
    else:
        td = groups                 # full groups dim (always layout-legal)
    tb = max(1, min(b, target_rows // td))
    grid = (pl.cdiv(b, tb), pl.cdiv(groups, td))

    # TODO(synk): if h*w is not a multiple of 128 (e.g. 7x7/14x14 maps), the
    # half-width output writes hit masked stores; pad HW (and divide stats by
    # the true HW) for full lane density.
    kernel = functools.partial(_sa_kernel, groups=groups)

    out = pl.pallas_call(
        kernel,
        out_shape=jax.ShapeDtypeStruct((b, groups, 2 * hw), x.dtype),
        grid=grid,
        in_specs=[
            pl.BlockSpec(memory_space=pltpu.MemorySpace.SMEM),             # 6 scalars
            pl.BlockSpec((tb, None, td, hw), lambda i, j: (i, 0, j, 0)),   # a = 0
            pl.BlockSpec((tb, None, td, hw), lambda i, j: (i, 1, j, 0)),   # a = 1
        ],
        out_specs=pl.BlockSpec((tb, td, 2 * hw), lambda i, j: (i, j, 0)),
        compiler_params=pltpu.CompilerParams(
            dimension_semantics=("parallel", "parallel"),
            vmem_limit_bytes=48 * 1024 * 1024,
        ),
    )(params, xv, xv)

    # (b, groups, 2*hw) is already the channel-shuffled layout (channel = 2d+a):
    # this reshape is free (contiguous).
    return out.reshape(b, c, h, w)


def _reference(x, params, groups):
    """Pure-JAX transcription of the PyTorch forward (for correctness check)."""
    w1, b1, w2, b2, gamma, beta = [params[i] for i in range(6)]
    b, c, h, w = x.shape
    n = b * groups
    xr = x.reshape(n, c // groups, h, w)
    x0, x1 = xr[:, :1], xr[:, 1:]

    xn = jnp.mean(x0, axis=(2, 3), keepdims=True)
    xn = x0 * jax.nn.sigmoid(w1 * xn + b1)

    mu = jnp.mean(x1, axis=(1, 2, 3), keepdims=True)
    var = jnp.mean((x1 - mu) ** 2, axis=(1, 2, 3), keepdims=True)
    xs = gamma * (x1 - mu) / jnp.sqrt(var + _GN_EPS) + beta
    xs = x1 * jax.nn.sigmoid(w2 * xs + b2)

    out = jnp.concatenate([xn, xs], axis=1).reshape(b, c, h, w)
    out = (
        out.reshape(b, 2, c // 2, h, w)
        .transpose(0, 2, 1, 3, 4)
        .reshape(b, c, h, w)
    )
    return out


if __name__ == "__main__":
    # small config consistent with the module: channel = 2 * groups
    batch, groups = 2, 2
    channel, height, width = 2 * groups, 16, 16   # x: [2, 4, 16, 16]

    key = jax.random.PRNGKey(0)
    kx, kw = jax.random.split(key)
    x = jax.random.normal(kx, (batch, channel, height, width), dtype=jnp.float32)

    # conv1/conv2 (1x1, 1->1): small random scalar weight/bias;
    # GroupNorm(1,1): weight=1, bias=0 (PyTorch defaults)
    conv_init = jax.random.normal(kw, (4,), dtype=jnp.float32) * 0.5
    params = jnp.array(
        [conv_init[0], conv_init[1], conv_init[2], conv_init[3], 1.0, 0.0],
        dtype=jnp.float32,
    )

    out = sa_layer_forward(x, params, groups)
    out = jax.block_until_ready(out)

    ref = _reference(x, params, groups)
    assert out.shape == (batch, channel, height, width)
    assert jnp.allclose(out, ref, atol=1e-5, rtol=1e-5), "mismatch vs reference"

    print("KERNEL_OK")
</pallas_src>

<mosaic_0001>
module attributes {stable_mosaic.version = 11 : i64} {
  func.func @_sa_kernel(%arg0: i32, %arg1: i32, %arg2: memref<6xf32, #tpu.memory_space<smem>>, %arg3: memref<2x1x2x256xf32, #tpu.memory_space<vmem>>, %arg4: memref<2x1x2x256xf32, #tpu.memory_space<vmem>>, %arg5: memref<2x2x512xf32, #tpu.memory_space<vmem>>) attributes {dimension_semantics = [#tpu.dimension_semantics<parallel>, #tpu.dimension_semantics<parallel>], iteration_bounds = array<i64: 1, 1>, scalar_prefetch = 0 : i64, scratch_operands = 0 : i64, tpu.core_type = #tpu.core_type<tc>, window_params = [{transform_indices = @transform_0, window_bounds = array<i64: 6>}, {transform_indices = @transform_1, window_bounds = array<i64: 2, 1, 2, 256>}, {transform_indices = @transform_2, window_bounds = array<i64: 2, 1, 2, 256>}, {transform_indices = @transform_3, window_bounds = array<i64: 2, 2, 512>}]} {
    %c0 = arith.constant 0 : index
    %0 = memref.load %arg2[%c0] : memref<6xf32, #tpu.memory_space<smem>>
    %c1 = arith.constant 1 : index
    %1 = memref.load %arg2[%c1] : memref<6xf32, #tpu.memory_space<smem>>
    %c2 = arith.constant 2 : index
    %2 = memref.load %arg2[%c2] : memref<6xf32, #tpu.memory_space<smem>>
    %c3 = arith.constant 3 : index
    %3 = memref.load %arg2[%c3] : memref<6xf32, #tpu.memory_space<smem>>
    %c4 = arith.constant 4 : index
    %4 = memref.load %arg2[%c4] : memref<6xf32, #tpu.memory_space<smem>>
    %c5 = arith.constant 5 : index
    %5 = memref.load %arg2[%c5] : memref<6xf32, #tpu.memory_space<smem>>
    %c2_i32 = arith.constant 2 : i32
    %6 = arith.muli %arg1, %c2_i32 : i32
    %7 = tpu.iota {dimensions = array<i32: 1>} : vector<1x2x1xi32>
    %8 = vector.broadcast %6 : i32 to vector<1x2x1xi32>
    %9 = arith.addi %8, %7 : vector<1x2x1xi32>
    %c0_0 = arith.constant 0 : index
    %c0_1 = arith.constant 0 : index
    %c0_2 = arith.constant 0 : index
    %c0_3 = arith.constant 0 : index
    %10 = vector.load %arg3[%c0_0, %c0_1, %c0_2, %c0_3] : memref<2x1x2x256xf32, #tpu.memory_space<vmem>>, vector<2x1x2x256xf32>
    %11 = vector.shape_cast %10 : vector<2x1x2x256xf32> to vector<2x2x256xf32>
    %cst = arith.constant dense<0.000000e+00> : vector<2x2xf32>
    %12 = vector.multi_reduction <add>, %11, %cst [2] : vector<2x2x256xf32> to vector<2x2xf32>
    %13 = vector.shape_cast %12 : vector<2x2xf32> to vector<2x2x1xf32>
    %cst_4 = arith.constant 3.906250e-03 : f32
    %14 = vector.broadcast %cst_4 : f32 to vector<2x2x1xf32>
    %15 = arith.mulf %13, %14 : vector<2x2x1xf32>
    %16 = arith.mulf %11, %11 : vector<2x2x256xf32>
    %cst_5 = arith.constant dense<0.000000e+00> : vector<2x2xf32>
    %17 = vector.multi_reduction <add>, %16, %cst_5 [2] : vector<2x2x256xf32> to vector<2x2xf32>
    %18 = vector.shape_cast %17 : vector<2x2xf32> to vector<2x2x1xf32>
    %cst_6 = arith.constant 3.906250e-03 : f32
    %19 = vector.broadcast %cst_6 : f32 to vector<2x2x1xf32>
    %20 = arith.mulf %18, %19 : vector<2x2x1xf32>
    %21 = arith.mulf %15, %15 : vector<2x2x1xf32>
    %22 = arith.subf %20, %21 : vector<2x2x1xf32>
    %cst_7 = arith.constant 0.000000e+00 : f32
    %23 = vector.broadcast %cst_7 : f32 to vector<2x2x1xf32>
    %24 = arith.maximumf %22, %23 : vector<2x2x1xf32>
    %cst_8 = arith.constant 9.99999974E-6 : f32
    %25 = vector.broadcast %cst_8 : f32 to vector<2x2x1xf32>
    %26 = arith.addf %24, %25 : vector<2x2x1xf32>
    %27 = math.rsqrt %26 : vector<2x2x1xf32>
    %28 = arith.mulf %2, %4 : f32
    %29 = vector.broadcast %28 : f32 to vector<2x2x1xf32>
    %30 = arith.mulf %29, %27 : vector<2x2x1xf32>
    %31 = vector.broadcast %4 : f32 to vector<2x2x1xf32>
    %32 = arith.mulf %31, %15 : vector<2x2x1xf32>
    %33 = arith.mulf %32, %27 : vector<2x2x1xf32>
    %34 = vector.broadcast %5 : f32 to vector<2x2x1xf32>
    %35 = arith.subf %34, %33 : vector<2x2x1xf32>
    %36 = vector.broadcast %2 : f32 to vector<2x2x1xf32>
    %37 = arith.mulf %36, %35 : vector<2x2x1xf32>
    %38 = vector.broadcast %3 : f32 to vector<2x2x1xf32>
    %39 = arith.addf %37, %38 : vector<2x2x1xf32>
    %40 = vector.broadcast %0 : f32 to vector<2x2x1xf32>
    %41 = arith.mulf %40, %15 : vector<2x2x1xf32>
    %42 = vector.broadcast %1 : f32 to vector<2x2x1xf32>
    %43 = arith.addf %41, %42 : vector<2x2x1xf32>
    %c0_i32 = arith.constant 0 : i32
    %44 = vector.broadcast %c0_i32 : i32 to vector<1x2x1xi32>
    %45 = arith.addi %44, %9 : vector<1x2x1xi32>
    %c2_i32_9 = arith.constant 2 : i32
    %c0_i32_10 = arith.constant 0 : i32
    %46 = arith.cmpi eq, %c2_i32_9, %c0_i32_10 : i32
    %c1_i32 = arith.constant 1 : i32
    %47 = arith.select %46, %c1_i32, %c2_i32_9 : i32
    %48 = vector.broadcast %47 : i32 to vector<1x2x1xi32>
    %49 = arith.remsi %45, %48 : vector<1x2x1xi32>
    %c0_i32_11 = arith.constant 0 : i32
    %50 = vector.broadcast %c0_i32_11 : i32 to vector<1x2x1xi32>
    %51 = arith.cmpi ne, %49, %50 : vector<1x2x1xi32>
    %c0_i32_12 = arith.constant 0 : i32
    %52 = vector.broadcast %c0_i32_12 : i32 to vector<1x2x1xi32>
    %53 = arith.cmpi slt, %49, %52 : vector<1x2x1xi32>
    %c0_i32_13 = arith.constant 0 : i32
    %54 = arith.cmpi slt, %47, %c0_i32_13 : i32
    %55 = vector.broadcast %54 : i1 to vector<1x2x1xi1>
    %56 = vector.broadcast %55 : vector<1x2x1xi1> to vector<1x2x1xi1>
    %57 = arith.xori %53, %56 : vector<1x2x1xi1>
    %58 = arith.andi %57, %51 : vector<1x2x1xi1>
    %59 = vector.broadcast %47 : i32 to vector<1x2x1xi32>
    %60 = arith.addi %49, %59 : vector<1x2x1xi32>
    %61 = arith.select %58, %60, %49 : vector<1x2x1xi1>, vector<1x2x1xi32>
    %c1_i32_14 = arith.constant 1 : i32
    %62 = vector.broadcast %c1_i32_14 : i32 to vector<1x2x1xi32>
    %63 = arith.cmpi eq, %61, %62 : vector<1x2x1xi32>
    %cst_15 = arith.constant 0.000000e+00 : f32
    %64 = vector.shape_cast %63 : vector<1x2x1xi1> to vector<1x2x1xi1>
    %65 = vector.broadcast %64 : vector<1x2x1xi1> to vector<2x2x1xi1>
    %66 = vector.broadcast %cst_15 : f32 to vector<2x2x1xf32>
    %67 = arith.select %65, %30, %66 : vector<2x2x1xi1>, vector<2x2x1xf32>
    %68 = vector.shape_cast %63 : vector<1x2x1xi1> to vector<1x2x1xi1>
    %69 = vector.broadcast %68 : vector<1x2x1xi1> to vector<2x2x1xi1>
    %70 = arith.select %69, %39, %43 : vector<2x2x1xi1>, vector<2x2x1xf32>
    %71 = vector.broadcast %67 : vector<2x2x1xf32> to vector<2x2x256xf32>
    %72 = arith.mulf %11, %71 : vector<2x2x256xf32>
    %73 = vector.broadcast %70 : vector<2x2x1xf32> to vector<2x2x256xf32>
    %74 = arith.addf %72, %73 : vector<2x2x256xf32>
    %75 = arith.negf %74 : vector<2x2x256xf32>
    %76 = math.exp %75 : vector<2x2x256xf32>
    %cst_16 = arith.constant 1.000000e+00 : f32
    %77 = vector.broadcast %cst_16 : f32 to vector<2x2x256xf32>
    %78 = arith.addf %77, %76 : vector<2x2x256xf32>
    %79 = arith.divf %77, %78 : vector<2x2x256xf32>
    %80 = arith.mulf %11, %79 : vector<2x2x256xf32>
    %c0_17 = arith.constant 0 : index
    %c0_18 = arith.constant 0 : index
    %c0_19 = arith.constant 0 : index
    %81 = vector.load %arg5[%c0_17, %c0_18, %c0_19] : memref<2x2x512xf32, #tpu.memory_space<vmem>>, vector<2x2x256xf32>
    tpu.vector_store %arg5[%c0_17, %c0_18, %c0_19], %80 {strides = array<i32>} : memref<2x2x512xf32, #tpu.memory_space<vmem>>, vector<2x2x256xf32>,
    %c0_20 = arith.constant 0 : index
    %c0_21 = arith.constant 0 : index
    %c0_22 = arith.constant 0 : index
    %c0_23 = arith.constant 0 : index
    %82 = vector.load %arg4[%c0_20, %c0_21, %c0_22, %c0_23] : memref<2x1x2x256xf32, #tpu.memory_space<vmem>>, vector<2x1x2x256xf32>
    %83 = vector.shape_cast %82 : vector<2x1x2x256xf32> to vector<2x2x256xf32>
    %cst_24 = arith.constant dense<0.000000e+00> : vector<2x2xf32>
    %84 = vector.multi_reduction <add>, %83, %cst_24 [2] : vector<2x2x256xf32> to vector<2x2xf32>
    %85 = vector.shape_cast %84 : vector<2x2xf32> to vector<2x2x1xf32>
    %cst_25 = arith.constant 3.906250e-03 : f32
    %86 = vector.broadcast %cst_25 : f32 to vector<2x2x1xf32>
    %87 = arith.mulf %85, %86 : vector<2x2x1xf32>
    %88 = arith.mulf %83, %83 : vector<2x2x256xf32>
    %cst_26 = arith.constant dense<0.000000e+00> : vector<2x2xf32>
    %89 = vector.multi_reduction <add>, %88, %cst_26 [2] : vector<2x2x256xf32> to vector<2x2xf32>
    %90 = vector.shape_cast %89 : vector<2x2xf32> to vector<2x2x1xf32>
    %cst_27 = arith.constant 3.906250e-03 : f32
    %91 = vector.broadcast %cst_27 : f32 to vector<2x2x1xf32>
    %92 = arith.mulf %90, %91 : vector<2x2x1xf32>
    %93 = arith.mulf %87, %87 : vector<2x2x1xf32>
    %94 = arith.subf %92, %93 : vector<2x2x1xf32>
    %cst_28 = arith.constant 0.000000e+00 : f32
    %95 = vector.broadcast %cst_28 : f32 to vector<2x2x1xf32>
    %96 = arith.maximumf %94, %95 : vector<2x2x1xf32>
    %cst_29 = arith.constant 9.99999974E-6 : f32
    %97 = vector.broadcast %cst_29 : f32 to vector<2x2x1xf32>
    %98 = arith.addf %96, %97 : vector<2x2x1xf32>
    %99 = math.rsqrt %98 : vector<2x2x1xf32>
    %100 = arith.mulf %2, %4 : f32
    %101 = vector.broadcast %100 : f32 to vector<2x2x1xf32>
    %102 = arith.mulf %101, %99 : vector<2x2x1xf32>
    %103 = vector.broadcast %4 : f32 to vector<2x2x1xf32>
    %104 = arith.mulf %103, %87 : vector<2x2x1xf32>
    %105 = arith.mulf %104, %99 : vector<2x2x1xf32>
    %106 = vector.broadcast %5 : f32 to vector<2x2x1xf32>
    %107 = arith.subf %106, %105 : vector<2x2x1xf32>
    %108 = vector.broadcast %2 : f32 to vector<2x2x1xf32>
    %109 = arith.mulf %108, %107 : vector<2x2x1xf32>
    %110 = vector.broadcast %3 : f32 to vector<2x2x1xf32>
    %111 = arith.addf %109, %110 : vector<2x2x1xf32>
    %112 = vector.broadcast %0 : f32 to vector<2x2x1xf32>
    %113 = arith.mulf %112, %87 : vector<2x2x1xf32>
    %114 = vector.broadcast %1 : f32 to vector<2x2x1xf32>
    %115 = arith.addf %113, %114 : vector<2x2x1xf32>
    %c2_i32_30 = arith.constant 2 : i32
    %116 = vector.broadcast %c2_i32_30 : i32 to vector<1x2x1xi32>
    %117 = arith.addi %116, %9 : vector<1x2x1xi32>
    %c2_i32_31 = arith.constant 2 : i32
    %c0_i32_32 = arith.constant 0 : i32
    %118 = arith.cmpi eq, %c2_i32_31, %c0_i32_32 : i32
    %c1_i32_33 = arith.constant 1 : i32
    %119 = arith.select %118, %c1_i32_33, %c2_i32_31 : i32
    %120 = vector.broadcast %119 : i32 to vector<1x2x1xi32>
    %121 = arith.remsi %117, %120 : vector<1x2x1xi32>
    %c0_i32_34 = arith.constant 0 : i32
    %122 = vector.broadcast %c0_i32_34 : i32 to vector<1x2x1xi32>
    %123 = arith.cmpi ne, %121, %122 : vector<1x2x1xi32>
    %c0_i32_35 = arith.constant 0 : i32
    %124 = vector.broadcast %c0_i32_35 : i32 to vector<1x2x1xi32>
    %125 = arith.cmpi slt, %121, %124 : vector<1x2x1xi32>
    %c0_i32_36 = arith.constant 0 : i32
    %126 = arith.cmpi slt, %119, %c0_i32_36 : i32
    %127 = vector.broadcast %126 : i1 to vector<1x2x1xi1>
    %128 = vector.broadcast %127 : vector<1x2x1xi1> to vector<1x2x1xi1>
    %129 = arith.xori %125, %128 : vector<1x2x1xi1>
    %130 = arith.andi %129, %123 : vector<1x2x1xi1>
    %131 = vector.broadcast %119 : i32 to vector<1x2x1xi32>
    %132 = arith.addi %121, %131 : vector<1x2x1xi32>
    %133 = arith.select %130, %132, %121 : vector<1x2x1xi1>, vector<1x2x1xi32>
    %c1_i32_37 = arith.constant 1 : i32
    %134 = vector.broadcast %c1_i32_37 : i32 to vector<1x2x1xi32>
    %135 = arith.cmpi eq, %133, %134 : vector<1x2x1xi32>
    %cst_38 = arith.constant 0.000000e+00 : f32
    %136 = vector.shape_cast %135 : vector<1x2x1xi1> to vector<1x2x1xi1>
    %137 = vector.broadcast %136 : vector<1x2x1xi1> to vector<2x2x1xi1>
    %138 = vector.broadcast %cst_38 : f32 to vector<2x2x1xf32>
    %139 = arith.select %137, %102, %138 : vector<2x2x1xi1>, vector<2x2x1xf32>
    %140 = vector.shape_cast %135 : vector<1x2x1xi1> to vector<1x2x1xi1>
    %141 = vector.broadcast %140 : vector<1x2x1xi1> to vector<2x2x1xi1>
    %142 = arith.select %141, %111, %115 : vector<2x2x1xi1>, vector<2x2x1xf32>
    %143 = vector.broadcast %139 : vector<2x2x1xf32> to vector<2x2x256xf32>
    %144 = arith.mulf %83, %143 : vector<2x2x256xf32>
    %145 = vector.broadcast %142 : vector<2x2x1xf32> to vector<2x2x256xf32>
    %146 = arith.addf %144, %145 : vector<2x2x256xf32>
    %147 = arith.negf %146 : vector<2x2x256xf32>
    %148 = math.exp %147 : vector<2x2x256xf32>
    %cst_39 = arith.constant 1.000000e+00 : f32
    %149 = vector.broadcast %cst_39 : f32 to vector<2x2x256xf32>
    %150 = arith.addf %149, %148 : vector<2x2x256xf32>
    %151 = arith.divf %149, %150 : vector<2x2x256xf32>
    %152 = arith.mulf %83, %151 : vector<2x2x256xf32>
    %c0_40 = arith.constant 0 : index
    %c0_41 = arith.constant 0 : index
    %c256 = arith.constant 256 : index
    %153 = vector.load %arg5[%c0_40, %c0_41, %c256] : memref<2x2x512xf32, #tpu.memory_space<vmem>>, vector<2x2x256xf32>
    tpu.vector_store %arg5[%c0_40, %c0_41, %c256], %152 {strides = array<i32>} : memref<2x2x512xf32, #tpu.memory_space<vmem>>, vector<2x2x256xf32>,
    return
  }
  func.func @transform_0(%arg0: i32, %arg1: i32) -> i32 {
    %c0_i32 = arith.constant 0 : i32
    %c0_i32_0 = arith.constant 0 : i32
    return %c0_i32 : i32
  }
  func.func @transform_1(%arg0: i32, %arg1: i32) -> (i32, i32, i32, i32) {
    %c0_i32 = arith.constant 0 : i32
    %c0_i32_0 = arith.constant 0 : i32
    %c0_i32_1 = arith.constant 0 : i32
    return %arg0, %c0_i32, %arg1, %c0_i32_0 : i32, i32, i32, i32
  }
  func.func @transform_2(%arg0: i32, %arg1: i32) -> (i32, i32, i32, i32) {
    %c1_i32 = arith.constant 1 : i32
    %c0_i32 = arith.constant 0 : i32
    %c0_i32_0 = arith.constant 0 : i32
    return %arg0, %c1_i32, %arg1, %c0_i32 : i32, i32, i32, i32
  }
  func.func @transform_3(%arg0: i32, %arg1: i32) -> (i32, i32, i32) {
    %c0_i32 = arith.constant 0 : i32
    %c0_i32_0 = arith.constant 0 : i32
    return %arg0, %arg1, %c0_i32 : i32, i32, i32
  }
}

</mosaic_0001>

<bundles_post_ra>
// kernel: sa_layer_forward.1
= control target key start
LH: loop header
LB: loop body
LE: loop exit
PB: predicated region body
PF: predicated region fallthrough
CT: control target
= control target key end

     0   :  { %8 = vsyncpa [#allocation3], 0  ;;  %s696_s0 = inlined_call_operand.vmem [shape: f32[6], index: 0, kind: input, shape index: {}]   ;;  %s697_s1 = inlined_call_operand.vmem [shape: f32[2,2,2,256], index: 1, kind: input, shape index: {}, may-alias: {1,2}]   ;;  %s698_s2 = inlined_call_operand.vmem [shape: f32[2,2,2,256], index: 2, kind: input, shape index: {}, may-alias: {1,2}]   ;;  %s699_s3 = inlined_call_operand.vmem [shape: f32[2,2,512], index: 3, kind: output, shape index: {}]  }
   0x1   :  { %s15_s14 = sshll.u32 %s696_s0, 4  ;;  %v36_v0 = vld [vmem:[%s697_s1] sm:$0xf]  ;;  %v38_v1 = vld [vmem:[%s697_s1 + $0x8] sm:$0xf]  ;;  %s16_s14 = int_to_ptr.vmem [resolvable:$true] %s15_s14 }
   0x2   :  { %37 = vst [vmem:[#allocation4] sm:$0xf] %v36_v0  ;;  %v498_v2 = vld [vmem:[%s698_s2 + $0x4] sm:$0xf]  ;;  %v499_v3 = vld [vmem:[%s698_s2 + $0xc] sm:$0xf]  ;;  %p541_p1 = scmp.lt.s32.totalorder %s16_s14, %s16_s14 }
   0x3   :  { %s536_s23 = scalar_lea.vmem %s16_s14, 16 }
   0x4   :  { %p537_p0 = scmp.ne.s32.totalorder %s16_s14, %s536_s23  ;;  %p542_p2 = scmp.lt.s32.totalorder %s536_s23, %s536_s23 }
   0x6   :  { %p543_p3 = por %p542_p2, %p541_p1 }
   0x8   :  { %p544_p4 = pnand %p543_p3, %p537_p0 }
   0xa   :  { %547 = shalt.err (!%p544_p4)
}
   0xb   :  { %s550_s0 = smov [#allocation2]   ;;  %39 = vst [vmem:[#allocation4 + $0x4] sm:$0xf] %v38_v1  ;;  %83 = vst [vmem:[#allocation5] sm:$0xf] %v498_v2 }
   0xc   :  { %18 = dma.vmem_to_smem %s16_s14, 16, %s550_s0, [#allocation3]   ;;  %85 = vst [vmem:[#allocation5 + $0x4] sm:$0xf] %v499_v3 }
   0xd   :  { %548 = dma.done.wait [#allocation3], 16  }
   0xe   :  { %549 = vsyncadd [#allocation3], 4294967280 }
   0xf   :  { %117 = sfence }
  0x10   :  { %v125_v4 = vlaneseq  ;;  %v551_v5 = vmov 1983009808   ;;  %v590_v9 = vld [vmem:[#allocation4] sm:$0xf]  ;;  %vm153_vm0 = vcmask 1041408   ;;  %s639_s1 = sld [smem:[#allocation2 + $0x2]] }
  0x11   :  { %v134_v6 = vunpack.c.l.s4 %v551_v5  ;;  %v166_v14 = vmul.f32 %v590_v9, %v590_v9  ;;  %s503_s2 = sld [smem:[#allocation2 + $0x4]]  ;;  %s118_s24 = sld [smem:[#allocation2]] }
  0x12   :  { %v588_v7 = vshrl.u32 %v125_v4, 7  ;;  %v594_v11 = vld [vmem:[#allocation4 + $0x4] sm:$0xf]  ;;  %v596_v12 = vld [vmem:[#allocation5] sm:$0xf]  ;;  %s500_s25 = sld [smem:[#allocation2 + $0x1]] }
  0x13   :  { %v135_v8 = vunpack.c.0.s8 %v134_v6  ;;  %v592_v10 = vld [vmem:[#allocation5 + $0x4] sm:$0xf]  ;;  %v167_v13 = vmul.f32 %v594_v11, %v594_v11  ;;  %v347_v17 = vmul.f32 %v596_v12, %v596_v12  ;;  %s504_s26 = sld [smem:[#allocation2 + $0x5]]  ;;  %s502_s27 = sld [smem:[#allocation2 + $0x3]] }
  0x14   :  { %v348_v15 = vmul.f32 %v592_v10, %v592_v10 }
  0x15   :  { %v138_v16 = vsub.s32 %v135_v8, %v588_v7 }
  0x17   :  { %v321_v18 = vrot.slane %v596_v12, %v138_v16  ;;  %v139_v19 = vrot.slane %v590_v9, %v138_v16  ;;  %v329_v20 = vrot.slane %v592_v10, %v138_v16  ;;  %v147_v21 = vrot.slane %v594_v11, %v138_v16  ;;  %s212_s28 = smul.f32 %s503_s2, %s639_s1 }
  0x18   :  { %v184_v22 = vrot.slane %v167_v13, %v138_v16  ;;  %v176_v23 = vrot.slane %v166_v14, %v138_v16  ;;  %v365_v24 = vrot.slane %v348_v15, %v138_v16  ;;  %v357_v32 = vrot.slane %v347_v17, %v138_v16 }
  0x19   :  { %v322_v25 = vcombine.high %v321_v18, %v321_v18  ;;  %v335_v26 = vsel %vm153_vm0, %v321_v18, 0.0  ;;  %v140_v27 = vcombine.high %v139_v19, %v139_v19  ;;  %v154_v28 = vsel %vm153_vm0, %v139_v19, 0.0 }
  0x1a   :  { %v330_v29 = vcombine.high %v329_v20, %v329_v20  ;;  %v340_v30 = vsel %vm153_vm0, %v329_v20, 0.0  ;;  %v148_v31 = vcombine.high %v147_v21, %v147_v21  ;;  %v159_v35 = vsel %vm153_vm0, %v147_v21, 0.0 }
  0x1b   :  { %v336_v33 = vsel %vm153_vm0, %v322_v25, 0.0  ;;  %v155_v34 = vsel %vm153_vm0, %v140_v27, 0.0  ;;  %v185_v36 = vcombine.high %v184_v22, %v184_v22  ;;  %v177_v41 = vcombine.high %v176_v23, %v176_v23 }
  0x1c   :  { %v337_v37 = vadd.f32 %v336_v33, %v335_v26  ;;  %v156_v38 = vadd.f32 %v155_v34, %v154_v28  ;;  %v341_v39 = vsel %vm153_vm0, %v330_v29, 0.0  ;;  %v160_v40 = vsel %vm153_vm0, %v148_v31, 0.0 }
  0x1d   :  { %v342_v42 = vadd.f32 %v341_v39, %v340_v30  ;;  %v161_v43 = vadd.f32 %v160_v40, %v159_v35  ;;  %v195_v44 = vsel %vm153_vm0, %v184_v22, 0.0  ;;  %v196_v45 = vsel %vm153_vm0, %v185_v36, 0.0 }
  0x1e   :  { %338 = vadd.xlane.f32.xlu1 %v337_v37  ;;  %157 = vadd.xlane.f32.xlu0 %v156_v38  ;;  %v190_v46 = vsel %vm153_vm0, %v176_v23, 0.0  ;;  %v191_v47 = vsel %vm153_vm0, %v177_v41, 0.0  ;;  %v366_v48 = vcombine.high %v365_v24, %v365_v24  ;;  %v358_v49 = vcombine.high %v357_v32, %v357_v32 }
  0x1f   :  { %v197_v50 = vadd.f32 %v196_v45, %v195_v44  ;;  %v192_v51 = vadd.f32 %v191_v47, %v190_v46  ;;  %v376_v52 = vsel %vm153_vm0, %v365_v24, 0.0  ;;  %v371_v54 = vsel %vm153_vm0, %v357_v32, 0.0 }
  0x20   :  { %v377_v53 = vsel %vm153_vm0, %v366_v48, 0.0  ;;  %v372_v55 = vsel %vm153_vm0, %v358_v49, 0.0  ;;  %v552_v29 = vmov 269488144   ;;  %v409_v33 = vadd.s32 2, %v588_v7 }
  0x21   :  { %v378_v56 = vadd.f32 %v377_v53, %v376_v52  ;;  %v373_v57 = vadd.f32 %v372_v55, %v371_v54  ;;  %v258_v30 = vunpack.c.l.s4 %v552_v29  ;;  %v240_v34 = vand.u32 1, %v588_v7 }
  0x22   :  { %343 = vadd.xlane.f32.xlu1 %v342_v42  ;;  %162 = vadd.xlane.f32.xlu0 %v161_v43  ;;  %v216_v36 = vstv %s503_s2  ;;  %v414_v37 = vand.u32 1, %v409_v33  ;;  %v213_v38 = vstv %s212_s28  ;;  %v230_v39 = vstv %s118_s24 }
  0x23   :  { %v259_v35 = vunpack.c.0.s8 %v258_v30  ;;  %v233_v40 = vstv %s500_s25  ;;  %vm644_vm1 = vcmp.eq.s32.totalorder %v240_v34, 1  ;;  %v221_v46 = vstv %s504_s26 }
  0x24   :  { %v224_v47 = vstv %s639_s1  ;;  %vm651_vm2 = vcmp.eq.s32.totalorder %v414_v37, 1 }
  0x25   :  { %v262_v45 = vsub.s32 %v259_v35, %v588_v7 }
  0x26   :  { %198 = vadd.xlane.f32.xlu1 %v197_v50  ;;  %193 = vadd.xlane.f32.xlu0 %v192_v51  ;;  %v227_v51 = vstv %s502_s27 }
  0x2a   :  { %379 = vadd.xlane.f32.xlu1 %v378_v56  ;;  %374 = vadd.xlane.f32.xlu0 %v373_v57 }
  0xab   :  { %v339_v58 = vpop.xlane.xlu1 %338  ;;  %v158_v59 = vpop.xlane.xlu0 %157 }
  0xac   :  { %v627_v62 = vmul.f32 0.00390625, %v158_v59  ;;  %v629_v0 = vmul.f32 0.00390625, %v339_v58 }
  0xae   :  { %v202_v6 = vmul.f32 %v627_v62, %v627_v62  ;;  %v383_v17 = vmul.f32 %v629_v0, %v629_v0  ;;  %v217_v44 = vmul.f32 %v216_v36, %v627_v62  ;;  %v395_v53 = vmul.f32 %v629_v0, %v216_v36 }
  0xaf   :  { %v344_v60 = vpop.xlane.xlu1 %343  ;;  %v163_v61 = vpop.xlane.xlu0 %162  ;;  %v405_v57 = vmul.f32 %v629_v0, %v230_v39 }
  0xb0   :  { %v165_v63 = vmul.f32 0.00390625, %v163_v61  ;;  %v631_v1 = vmul.f32 0.00390625, %v344_v60  ;;  %v231_v61 = vmul.f32 %v230_v39, %v627_v62 }
  0xb1   :  { %v407_v35 = vadd.f32 %v405_v57, %v233_v40 }
  0xb2   :  { %v203_v5 = vmul.f32 %v165_v63, %v165_v63  ;;  %v384_v15 = vmul.f32 %v631_v1, %v631_v1  ;;  %v218_v41 = vmul.f32 %v216_v36, %v165_v63  ;;  %v232_v54 = vmul.f32 %v230_v39, %v165_v63 }
  0xb3   :  { %v199_v2 = vpop.xlane.xlu1 %198  ;;  %v194_v3 = vpop.xlane.xlu0 %193  ;;  %v396_v58 = vmul.f32 %v631_v1, %v216_v36 }
  0xb4   :  { %v201_v4 = vmul.f32 0.00390625, %v199_v2  ;;  %v200_v8 = vmul.f32 0.00390625, %v194_v3  ;;  %v406_v2 = vmul.f32 %v631_v1, %v230_v39  ;;  %v234_v1 = vadd.f32 %v233_v40, %v231_v61 }
  0xb6   :  { %v205_v13 = vsub.f32 %v201_v4, %v203_v5  ;;  %v204_v14 = vsub.f32 %v200_v8, %v202_v6 }
  0xb7   :  { %v380_v16 = vpop.xlane.xlu1 %379  ;;  %v375_v18 = vpop.xlane.xlu0 %374 }
  0xb8   :  { %v207_v19 = vmax.f32 %v205_v13, 0.0  ;;  %v206_v20 = vmax.f32 %v204_v14, 0.0  ;;  %v382_v21 = vmul.f32 0.00390625, %v380_v16  ;;  %v381_v22 = vmul.f32 0.00390625, %v375_v18 }
  0xb9   :  { %v235_v13 = vadd.f32 %v233_v40, %v232_v54 }
  0xba   :  { %v209_v23 = vadd.f32 1e-05, %v207_v19  ;;  %v208_v24 = vadd.f32 1e-05, %v206_v20  ;;  %v386_v25 = vsub.f32 %v382_v21, %v384_v15  ;;  %v385_v26 = vsub.f32 %v381_v22, %v383_v17 }
  0xbc   :  { %512 = vrsqrt.f32 %v209_v23  ;;  %v388_v27 = vmax.f32 %v386_v25, 0.0  ;;  %v387_v28 = vmax.f32 %v385_v26, 0.0  ;;  %v408_v23 = vadd.f32 %v406_v2, %v233_v40 }
  0xbd   :  { %514 = vrsqrt.f32 %v208_v24 }
  0xbe   :  { %v390_v31 = vadd.f32 1e-05, %v388_v27  ;;  %v389_v32 = vadd.f32 1e-05, %v387_v28 }
  0xc0   :  { %516 = vrsqrt.f32 %v390_v31 }
  0xc1   :  { %518 = vrsqrt.f32 %v389_v32 }
  0xc6   :  { %v513_v43 = vpop.eup %512 }
  0xc7   :  { %v515_v48 = vpop.eup %514  ;;  %v215_v49 = vmul.f32 %v513_v43, %v213_v38  ;;  %v220_v50 = vmul.f32 %v513_v43, %v218_v41 }
  0xc8   :  { %v214_v55 = vmul.f32 %v515_v48, %v213_v38  ;;  %v219_v56 = vmul.f32 %v515_v48, %v217_v44 }
  0xc9   :  { %v223_v7 = vsub.f32 %v221_v46, %v220_v50  ;;  %v252_v59 = vsel %vm644_vm1, %v215_v49, 0.0 }
  0xca   :  { %v517_v60 = vpop.eup %516  ;;  %v222_v3 = vsub.f32 %v221_v46, %v219_v56  ;;  %v251_v4 = vsel %vm644_vm1, %v214_v55, 0.0  ;;  %v270_v6 = vrot.slane %v252_v59, %v262_v45 }
  0xcb   :  { %v519_v63 = vpop.eup %518  ;;  %v226_v5 = vmul.f32 %v224_v47, %v223_v7  ;;  %v394_v8 = vmul.f32 %v517_v60, %v213_v38  ;;  %v398_v0 = vmul.f32 %v517_v60, %v396_v58  ;;  %v263_v18 = vrot.slane %v251_v4, %v262_v45 }
  0xcc   :  { %v225_v14 = vmul.f32 %v224_v47, %v222_v3  ;;  %v393_v15 = vmul.f32 %v519_v63, %v213_v38  ;;  %v397_v16 = vmul.f32 %v519_v63, %v395_v53  ;;  %v274_v25 = vmul.f32 %v270_v6, %v594_v11 }
  0xcd   :  { %v229_v17 = vadd.f32 %v227_v51, %v226_v5  ;;  %v400_v19 = vsub.f32 %v221_v46, %v398_v0  ;;  %v426_v62 = vsel %vm651_vm2, %v394_v8, 0.0  ;;  %v273_v31 = vmul.f32 %v263_v18, %v590_v9 }
  0xce   :  { %v228_v20 = vadd.f32 %v227_v51, %v225_v14  ;;  %v399_v21 = vsub.f32 %v221_v46, %v397_v16  ;;  %v425_v22 = vsel %vm651_vm2, %v393_v15, 0.0  ;;  %v444_v29 = vrot.slane %v426_v62, %v262_v45 }
  0xcf   :  { %v254_v24 = vsel %vm644_vm1, %v229_v17, %v235_v13  ;;  %v402_v26 = vmul.f32 %v400_v19, %v224_v47  ;;  %v437_v34 = vrot.slane %v425_v22, %v262_v45 }
  0xd0   :  { %v290_v27 = vrot.slane %v254_v24, %v262_v45  ;;  %v253_v28 = vsel %vm644_vm1, %v228_v20, %v234_v1  ;;  %v401_v30 = vmul.f32 %v399_v21, %v224_v47  ;;  %v448_v43 = vmul.f32 %v444_v29, %v592_v10 }
  0xd1   :  { %v283_v32 = vrot.slane %v253_v28, %v262_v45  ;;  %v404_v33 = vadd.f32 %v402_v26, %v227_v51  ;;  %v447_v47 = vmul.f32 %v437_v34, %v596_v12 }
  0xd2   :  { %v294_v36 = vadd.f32 %v290_v27, %v274_v25  ;;  %v403_v37 = vadd.f32 %v401_v30, %v227_v51 }
  0xd3   :  { %v293_v38 = vadd.f32 %v283_v32, %v273_v31  ;;  %v428_v39 = vsel %vm651_vm2, %v404_v33, %v408_v23 }
  0xd4   :  { %v506_v41 = vmul.f32 -1.442695, %v294_v36  ;;  %v464_v44 = vrot.slane %v428_v39, %v262_v45  ;;  %v427_v42 = vsel %vm651_vm2, %v403_v37, %v407_v35 }
  0xd5   :  { %v505_v46 = vmul.f32 -1.442695, %v293_v38  ;;  %v457_v48 = vrot.slane %v427_v42, %v262_v45 }
  0xd6   :  { %520 = vpow2.f32 %v506_v41  ;;  %v468_v49 = vadd.f32 %v464_v44, %v448_v43 }
  0xd7   :  { %522 = vpow2.f32 %v505_v46  ;;  %v467_v40 = vadd.f32 %v457_v48, %v447_v47 }
  0xd8   :  { %v508_v50 = vmul.f32 -1.442695, %v468_v49 }
  0xd9   :  { %v507_v51 = vmul.f32 -1.442695, %v467_v40 }
  0xda   :  { %524 = vpow2.f32 %v508_v50 }
  0xdb   :  { %526 = vpow2.f32 %v507_v51 }
  0xe0   :  { %v521_v53 = vpop.eup %520 }
  0xe1   :  { %v523_v54 = vpop.eup %522  ;;  %v302_v55 = vadd.f32 1.0, %v521_v53 }
  0xe2   :  { %v301_v56 = vadd.f32 1.0, %v523_v54 }
  0xe3   :  { %528 = vrcp.f32 %v302_v55 }
  0xe4   :  { %v525_v57 = vpop.eup %524  ;;  %530 = vrcp.f32 %v301_v56 }
  0xe5   :  { %v527_v52 = vpop.eup %526  ;;  %v476_v58 = vadd.f32 1.0, %v525_v57 }
  0xe6   :  { %v475_v7 = vadd.f32 1.0, %v527_v52 }
  0xe7   :  { %532 = vrcp.f32 %v476_v58 }
  0xe8   :  { %534 = vrcp.f32 %v475_v7 }
  0xed   :  { %v529_v45 = vpop.eup %528 }
  0xee   :  { %v531_v59 = vpop.eup %530  ;;  %v308_v60 = vmul.f32 %v529_v45, %v594_v11 }
  0xef   :  { %v307_v61 = vmul.f32 %v531_v59, %v590_v9 }
  0xf0   :  { %310 = vst [vmem:[%s699_s3 + $0x8] sm:$0xf] %v308_v60 }
  0xf1   :  { %v533_v2 = vpop.eup %532  ;;  %309 = vst [vmem:[%s699_s3] sm:$0xf] %v307_v61 }
  0xf2   :  { %v535_v3 = vpop.eup %534  ;;  %v482_v4 = vmul.f32 %v533_v2, %v592_v10 }
  0xf3   :  { %v481_v63 = vmul.f32 %v535_v3, %v596_v12 }
  0xf4   :  { %484 = vst [vmem:[%s699_s3 + $0xc] sm:$0xf] %v482_v4 }
  0xf5   :  { %483 = vst [vmem:[%s699_s3 + $0x4] sm:$0xf] %v481_v63 }
  0xf6   :  { %489 = vsyncpa [#allocation3], 1 }

</bundles_post_ra>
